<compile_context>
chip_gen: v7x
topology: tpu7x:2x2x1
jax: 0.10.0
libtpu: 0.0.40
codegen_flags: <defaults>
</compile_context>

<pallas_src>
import functools

import jax
import jax.numpy as jnp
from jax import lax
from jax.experimental import pallas as pl
from jax.experimental.pallas import tpu as pltpu


def _round_up(x, m):
    return (x + m - 1) // m * m


def _choose_bt(B, block_b):
    """Pick the batch tile size.

    Targets >= 2 grid steps when the batch allows it (v7x: two TensorCores share
    the "parallel" grid axis) and floors large tiles to multiples of 256 so
    v6e/v7x 256x256 MXU passes stay full.  Always a multiple of 16 (bf16
    sublane packing)."""
    Bp = _round_up(B, 16)
    if Bp <= 16:
        return Bp                                # single tiny tile
    half = _round_up(pl.cdiv(Bp, 2), 16)         # at least two grid steps
    bt = min(_round_up(block_b, 16), half)
    if bt >= 256:
        bt = (bt // 256) * 256                   # 256-aligned for big tiles
    return max(bt, 16)


def actor_kernel(x_ref,                      # (bt, S)        f32
                 w1_ref, b1_ref,             # (S, H) bf16,   (1, H) f32
                 w2_ref, b2_ref,             # (H, H) bf16,   (1, H) f32
                 wh_ref, bh_ref,             # (H, Hw) bf16,  (1, Hw) f32 (fused, zero-padded head)
                 out_ref,                    # (bt, Hw) f32   cols [0,A)=mu, [A,2A)=std, rest pad
                 *, action_bound, num_action):
    # Cast to bf16 in-kernel (no separate wrapper-side cast pass over x).
    x = x_ref[...].astype(jnp.bfloat16)

    # fc1 + ReLU (bf16 MXU, f32 accumulate, f32 epilogue)
    h1 = jnp.dot(x, w1_ref[...], preferred_element_type=jnp.float32) + b1_ref[...]
    h1 = jnp.maximum(h1, 0.0).astype(jnp.bfloat16)

    # fc2 + ReLU
    h2 = jnp.dot(h1, w2_ref[...], preferred_element_type=jnp.float32) + b2_ref[...]
    h2 = jnp.maximum(h2, 0.0).astype(jnp.bfloat16)

    # Fused head: [mu_lin || std_lin || zero-pad] in one MXU op, 128+ lanes wide.
    lin = jnp.dot(h2, wh_ref[...], preferred_element_type=jnp.float32) + bh_ref[...]

    # mu branch and std branch computed full-width (EUP work is free at this size),
    # then selected per-lane: columns [0, A) -> mu, [A, Hw) -> std (pad lanes are
    # finite garbage and get sliced off in the wrapper).
    mu = action_bound * jnp.tanh(lin)
    # Softplus matching torch (beta=1, threshold=20): x for x>20 else log1p(exp(x)).
    std = jnp.where(lin > 20.0, lin, jnp.log1p(jnp.exp(lin))) + 0.001

    col = lax.broadcasted_iota(jnp.int32, lin.shape, dimension=1)
    out_ref[...] = jnp.where(col < num_action, mu, std).astype(out_ref.dtype)


def prepare_actor_params(params):
    """One-time parameter prep (hoisted out of the per-call forward):
    fuse the mu/std heads, zero-pad the head to a lane-dense (>=128) width,
    and cast MXU inputs to bf16 / biases to f32."""
    A = params["wmu"].shape[1]
    head_w = max(128, _round_up(2 * A, 128))

    wh = jnp.concatenate([params["wmu"], params["wstd"]], axis=1)   # (H, 2A)
    bh = jnp.concatenate([params["bmu"], params["bstd"]], axis=1)   # (1, 2A)
    wh = jnp.pad(wh, ((0, 0), (0, head_w - 2 * A)))                 # (H, head_w)
    bh = jnp.pad(bh, ((0, 0), (0, head_w - 2 * A)))                 # (1, head_w)

    return {
        "w1": params["w1"].astype(jnp.bfloat16),
        "b1": params["b1"].astype(jnp.float32),
        "w2": params["w2"].astype(jnp.bfloat16),
        "b2": params["b2"].astype(jnp.float32),
        "wh": wh.astype(jnp.bfloat16),
        "bh": bh.astype(jnp.float32),
        "num_action": int(A),        # python ints: static kernel config
        "head_width": int(head_w),
    }


def actor_forward(x, prepared, *, action_bound=1.0, block_b=1024):
    """x: (B, num_state) float32.  prepared: output of prepare_actor_params().
    Returns (mu, std), each (B, num_action) float32."""
    B, S = x.shape
    A = prepared["num_action"]
    head_w = prepared["head_width"]
    H = prepared["w1"].shape[1]

    bt = _choose_bt(B, block_b)
    Bp = _round_up(B, bt)
    xp = x if Bp == B else jnp.pad(x, ((0, Bp - B), (0, 0)))

    kernel = functools.partial(
        actor_kernel, action_bound=float(action_bound), num_action=A)

    def const2d(shape):
        # Weights/biases: same block every grid step -> stay VMEM-resident.
        return pl.BlockSpec(shape, lambda i: (0, 0))

    out = pl.pallas_call(
        kernel,
        out_shape=jax.ShapeDtypeStruct((Bp, head_w), jnp.float32),
        grid=(Bp // bt,),
        in_specs=[
            pl.BlockSpec((bt, S), lambda i: (i, 0)),   # x (tiled on batch, f32)
            const2d((S, H)),                           # w1
            const2d((1, H)),                           # b1
            const2d((H, H)),                           # w2
            const2d((1, H)),                           # b2
            const2d((H, head_w)),                      # fused, lane-dense head weight
            const2d((1, head_w)),                      # fused head bias
        ],
        out_specs=pl.BlockSpec((bt, head_w), lambda i: (i, 0)),
        compiler_params=pltpu.CompilerParams(
            dimension_semantics=("parallel",)),
    )(xp, prepared["w1"], prepared["b1"], prepared["w2"], prepared["b2"],
      prepared["wh"], prepared["bh"])

    mu = out[:B, :A]
    std = out[:B, A:2 * A]
    return mu, std


def init_actor_params(key, num_state, num_action, hidden_layer=128):
    """Deterministic init mimicking PyTorch's default Linear init:
    U(-1/sqrt(fan_in), 1/sqrt(fan_in)) for both weights and biases.
    Weights stored transposed: (in_features, out_features), all f32."""
    def linear(key, fan_in, fan_out):
        kw, kb = jax.random.split(key)
        bound = 1.0 / jnp.sqrt(float(fan_in))
        w = jax.random.uniform(kw, (fan_in, fan_out), jnp.float32, -bound, bound)
        b = jax.random.uniform(kb, (1, fan_out), jnp.float32, -bound, bound)
        return w, b

    k1, k2, k3, k4 = jax.random.split(key, 4)
    w1, b1 = linear(k1, num_state, hidden_layer)
    w2, b2 = linear(k2, hidden_layer, hidden_layer)
    wmu, bmu = linear(k3, hidden_layer, num_action)
    wstd, bstd = linear(k4, hidden_layer, num_action)
    return {
        "w1": w1, "b1": b1,
        "w2": w2, "b2": b2,
        "wmu": wmu, "bmu": bmu,
        "wstd": wstd, "bstd": bstd,
    }


def actor_forward_ref(x, params, *, action_bound=1.0):
    """Pure-JAX f32 reference for correctness checking."""
    h1 = jax.nn.relu(x @ params["w1"] + params["b1"])
    h2 = jax.nn.relu(h1 @ params["w2"] + params["b2"])
    mu = action_bound * jnp.tanh(h2 @ params["wmu"] + params["bmu"])
    std = jax.nn.softplus(h2 @ params["wstd"] + params["bstd"]) + 0.001
    return mu, std


if __name__ == "__main__":
    # Small shapes consistent with the module's forward:
    # batch=8, num_state=16, hidden_layer=128, num_action=4
    B, NUM_STATE, HIDDEN, NUM_ACTION = 8, 16, 128, 4
    ACTION_BOUND = 1.0

    key = jax.random.PRNGKey(0)
    k_params, k_x, k_x2 = jax.random.split(key, 3)

    params = init_actor_params(k_params, NUM_STATE, NUM_ACTION, HIDDEN)
    prepared = prepare_actor_params(params)     # one-time weight prep (hoisted)
    jax.block_until_ready((prepared["w1"], prepared["wh"]))

    # --- small batch (single grid step, lane-dense padded head) ---
    x = jax.random.normal(k_x, (B, NUM_STATE), jnp.float32)
    mu, std = actor_forward(x, prepared, action_bound=ACTION_BOUND)
    jax.block_until_ready((mu, std))

    mu_ref, std_ref = actor_forward_ref(x, params, action_bound=ACTION_BOUND)
    assert mu.shape == (B, NUM_ACTION) and std.shape == (B, NUM_ACTION)
    # bf16 MXU inputs -> looser tolerance than the pure-f32 path.
    assert jnp.allclose(mu, mu_ref, atol=3e-2, rtol=3e-2)
    assert jnp.allclose(std, std_ref, atol=3e-2, rtol=3e-2)
    assert bool(jnp.all(std > 0.0))

    # --- larger, non-multiple batch with a real multi-step grid (exercises
    #     padding, batch tiling, and VMEM-resident weights across grid steps) ---
    B2 = 40
    x2 = jax.random.normal(k_x2, (B2, NUM_STATE), jnp.float32)
    mu2, std2 = actor_forward(x2, prepared, action_bound=ACTION_BOUND, block_b=16)
    jax.block_until_ready((mu2, std2))

    mu2_ref, std2_ref = actor_forward_ref(x2, params, action_bound=ACTION_BOUND)
    assert mu2.shape == (B2, NUM_ACTION) and std2.shape == (B2, NUM_ACTION)
    assert jnp.allclose(mu2, mu2_ref, atol=3e-2, rtol=3e-2)
    assert jnp.allclose(std2, std2_ref, atol=3e-2, rtol=3e-2)
    assert bool(jnp.all(std2 > 0.0))

    # --- default block_b path (>=2 grid steps targeted for v7x dual-TC) ---
    mu3, std3 = actor_forward(x2, prepared, action_bound=ACTION_BOUND)
    jax.block_until_ready((mu3, std3))
    assert jnp.allclose(mu3, mu2_ref, atol=3e-2, rtol=3e-2)
    assert jnp.allclose(std3, std2_ref, atol=3e-2, rtol=3e-2)

    print("KERNEL_OK")
</pallas_src>

<mosaic_0001>
module attributes {stable_mosaic.version = 11 : i64} {
  func.func @actor_kernel(%arg0: i32, %arg1: memref<16x16xf32, #tpu.memory_space<vmem>>, %arg2: memref<16x128xbf16, #tpu.memory_space<vmem>>, %arg3: memref<1x128xf32, #tpu.memory_space<vmem>>, %arg4: memref<128x128xbf16, #tpu.memory_space<vmem>>, %arg5: memref<1x128xf32, #tpu.memory_space<vmem>>, %arg6: memref<128x128xbf16, #tpu.memory_space<vmem>>, %arg7: memref<1x128xf32, #tpu.memory_space<vmem>>, %arg8: memref<16x128xf32, #tpu.memory_space<vmem>>) attributes {dimension_semantics = [#tpu.dimension_semantics<parallel>], iteration_bounds = array<i64: 1>, scalar_prefetch = 0 : i64, scratch_operands = 0 : i64, tpu.core_type = #tpu.core_type<tc>, window_params = [{transform_indices = @transform_0, window_bounds = array<i64: 16, 16>}, {pipeline_mode = #tpu.pipeline_mode<synchronous>, transform_indices = @transform_1, window_bounds = array<i64: 16, 128>}, {pipeline_mode = #tpu.pipeline_mode<synchronous>, transform_indices = @transform_2, window_bounds = array<i64: 1, 128>}, {pipeline_mode = #tpu.pipeline_mode<synchronous>, transform_indices = @transform_3, window_bounds = array<i64: 128, 128>}, {pipeline_mode = #tpu.pipeline_mode<synchronous>, transform_indices = @transform_4, window_bounds = array<i64: 1, 128>}, {pipeline_mode = #tpu.pipeline_mode<synchronous>, transform_indices = @transform_5, window_bounds = array<i64: 128, 128>}, {pipeline_mode = #tpu.pipeline_mode<synchronous>, transform_indices = @transform_6, window_bounds = array<i64: 1, 128>}, {transform_indices = @transform_7, window_bounds = array<i64: 16, 128>}]} {
    %c0 = arith.constant 0 : index
    %c0_0 = arith.constant 0 : index
    %0 = vector.load %arg1[%c0, %c0_0] : memref<16x16xf32, #tpu.memory_space<vmem>>, vector<16x16xf32>
    %1 = arith.truncf %0 : vector<16x16xf32> to vector<16x16xbf16>
    %c0_1 = arith.constant 0 : index
    %c0_2 = arith.constant 0 : index
    %2 = vector.load %arg2[%c0_1, %c0_2] : memref<16x128xbf16, #tpu.memory_space<vmem>>, vector<16x128xbf16>
    %cst = arith.constant dense<0.000000e+00> : vector<16x128xf32>
    %3 = tpu.matmul %1, %2, %cst {dimension_numbers = #tpu.dot_dimension_numbers<[1], [0], [0], [1], [0, 0, 1, 1], [], []>} : vector<16x16xbf16>, vector<16x128xbf16>, vector<16x128xf32> -> vector<16x128xf32>
    %c0_3 = arith.constant 0 : index
    %c0_4 = arith.constant 0 : index
    %4 = vector.load %arg3[%c0_3, %c0_4] : memref<1x128xf32, #tpu.memory_space<vmem>>, vector<1x128xf32>
    %5 = vector.broadcast %4 : vector<1x128xf32> to vector<16x128xf32>
    %6 = arith.addf %3, %5 : vector<16x128xf32>
    %cst_5 = arith.constant 0.000000e+00 : f32
    %7 = vector.broadcast %cst_5 : f32 to vector<16x128xf32>
    %8 = arith.maximumf %6, %7 : vector<16x128xf32>
    %9 = arith.truncf %8 : vector<16x128xf32> to vector<16x128xbf16>
    %c0_6 = arith.constant 0 : index
    %c0_7 = arith.constant 0 : index
    %10 = vector.load %arg4[%c0_6, %c0_7] : memref<128x128xbf16, #tpu.memory_space<vmem>>, vector<128x128xbf16>
    %cst_8 = arith.constant dense<0.000000e+00> : vector<16x128xf32>
    %11 = tpu.matmul %9, %10, %cst_8 {dimension_numbers = #tpu.dot_dimension_numbers<[1], [0], [0], [1], [0, 0, 1, 1], [], []>} : vector<16x128xbf16>, vector<128x128xbf16>, vector<16x128xf32> -> vector<16x128xf32>
    %c0_9 = arith.constant 0 : index
    %c0_10 = arith.constant 0 : index
    %12 = vector.load %arg5[%c0_9, %c0_10] : memref<1x128xf32, #tpu.memory_space<vmem>>, vector<1x128xf32>
    %13 = vector.broadcast %12 : vector<1x128xf32> to vector<16x128xf32>
    %14 = arith.addf %11, %13 : vector<16x128xf32>
    %cst_11 = arith.constant 0.000000e+00 : f32
    %15 = vector.broadcast %cst_11 : f32 to vector<16x128xf32>
    %16 = arith.maximumf %14, %15 : vector<16x128xf32>
    %17 = arith.truncf %16 : vector<16x128xf32> to vector<16x128xbf16>
    %c0_12 = arith.constant 0 : index
    %c0_13 = arith.constant 0 : index
    %18 = vector.load %arg6[%c0_12, %c0_13] : memref<128x128xbf16, #tpu.memory_space<vmem>>, vector<128x128xbf16>
    %cst_14 = arith.constant dense<0.000000e+00> : vector<16x128xf32>
    %19 = tpu.matmul %17, %18, %cst_14 {dimension_numbers = #tpu.dot_dimension_numbers<[1], [0], [0], [1], [0, 0, 1, 1], [], []>} : vector<16x128xbf16>, vector<128x128xbf16>, vector<16x128xf32> -> vector<16x128xf32>
    %c0_15 = arith.constant 0 : index
    %c0_16 = arith.constant 0 : index
    %20 = vector.load %arg7[%c0_15, %c0_16] : memref<1x128xf32, #tpu.memory_space<vmem>>, vector<1x128xf32>
    %21 = vector.broadcast %20 : vector<1x128xf32> to vector<16x128xf32>
    %22 = arith.addf %19, %21 : vector<16x128xf32>
    %23 = math.tanh %22 : vector<16x128xf32>
    %cst_17 = arith.constant 1.000000e+00 : f32
    %24 = vector.broadcast %cst_17 : f32 to vector<16x128xf32>
    %25 = arith.mulf %24, %23 : vector<16x128xf32>
    %cst_18 = arith.constant 2.000000e+01 : f32
    %26 = vector.broadcast %cst_18 : f32 to vector<16x128xf32>
    %27 = arith.cmpf ogt, %22, %26 : vector<16x128xf32>
    %28 = math.exp %22 : vector<16x128xf32>
    %29 = math.log1p %28 : vector<16x128xf32>
    %30 = arith.select %27, %22, %29 : vector<16x128xi1>, vector<16x128xf32>
    %cst_19 = arith.constant 1.000000e-03 : f32
    %31 = vector.broadcast %cst_19 : f32 to vector<16x128xf32>
    %32 = arith.addf %30, %31 : vector<16x128xf32>
    %33 = tpu.iota {dimensions = array<i32: 1>} : vector<16x128xi32>
    %c4_i32 = arith.constant 4 : i32
    %34 = vector.broadcast %c4_i32 : i32 to vector<16x128xi32>
    %35 = arith.cmpi slt, %33, %34 : vector<16x128xi32>
    %36 = arith.select %35, %25, %32 : vector<16x128xi1>, vector<16x128xf32>
    %c0_20 = arith.constant 0 : index
    %c0_21 = arith.constant 0 : index
    %37 = vector.load %arg8[%c0_20, %c0_21] : memref<16x128xf32, #tpu.memory_space<vmem>>, vector<16x128xf32>
    tpu.vector_store %arg8[%c0_20, %c0_21], %36 {strides = array<i32>} : memref<16x128xf32, #tpu.memory_space<vmem>>, vector<16x128xf32>,
    return
  }
  func.func @transform_0(%arg0: i32) -> (i32, i32) {
    %c0_i32 = arith.constant 0 : i32
    %c0_i32_0 = arith.constant 0 : i32
    return %arg0, %c0_i32 : i32, i32
  }
  func.func @transform_1(%arg0: i32) -> (i32, i32) {
    %c0_i32 = arith.constant 0 : i32
    %c0_i32_0 = arith.constant 0 : i32
    %c0_i32_1 = arith.constant 0 : i32
    return %c0_i32, %c0_i32_0 : i32, i32
  }
  func.func @transform_2(%arg0: i32) -> (i32, i32) {
    %c0_i32 = arith.constant 0 : i32
    %c0_i32_0 = arith.constant 0 : i32
    %c0_i32_1 = arith.constant 0 : i32
    return %c0_i32, %c0_i32_0 : i32, i32
  }
  func.func @transform_3(%arg0: i32) -> (i32, i32) {
    %c0_i32 = arith.constant 0 : i32
    %c0_i32_0 = arith.constant 0 : i32
    %c0_i32_1 = arith.constant 0 : i32
    return %c0_i32, %c0_i32_0 : i32, i32
  }
  func.func @transform_4(%arg0: i32) -> (i32, i32) {
    %c0_i32 = arith.constant 0 : i32
    %c0_i32_0 = arith.constant 0 : i32
    %c0_i32_1 = arith.constant 0 : i32
    return %c0_i32, %c0_i32_0 : i32, i32
  }
  func.func @transform_5(%arg0: i32) -> (i32, i32) {
    %c0_i32 = arith.constant 0 : i32
    %c0_i32_0 = arith.constant 0 : i32
    %c0_i32_1 = arith.constant 0 : i32
    return %c0_i32, %c0_i32_0 : i32, i32
  }
  func.func @transform_6(%arg0: i32) -> (i32, i32) {
    %c0_i32 = arith.constant 0 : i32
    %c0_i32_0 = arith.constant 0 : i32
    %c0_i32_1 = arith.constant 0 : i32
    return %c0_i32, %c0_i32_0 : i32, i32
  }
  func.func @transform_7(%arg0: i32) -> (i32, i32) {
    %c0_i32 = arith.constant 0 : i32
    %c0_i32_0 = arith.constant 0 : i32
    return %arg0, %c0_i32 : i32, i32
  }
}

</mosaic_0001>

<bundles_post_ra>
// kernel: tpu_custom_call.1
= control target key start
LH: loop header
LB: loop body
LE: loop exit
PB: predicated region body
PF: predicated region fallthrough
CT: control target
= control target key end

     0   :  { %12 = vsyncpa [#allocation3], 0  ;;  %s842_s0 = inlined_call_operand.hbm [shape: f32[16,16], index: 0, kind: input, shape index: {}]   ;;  %s843_s1 = inlined_call_operand.hbm [shape: bf16[16,128], index: 1, kind: input, shape index: {}]   ;;  %s844_s2 = inlined_call_operand.vmem [shape: f32[1,128], index: 2, kind: input, shape index: {}]   ;;  %s845_s3 = inlined_call_operand.hbm [shape: bf16[128,128], index: 3, kind: input, shape index: {}]   ;;  %s846_s4 = inlined_call_operand.vmem [shape: f32[1,128], index: 4, kind: input, shape index: {}]   ;;  %s847_s5 = inlined_call_operand.hbm [shape: bf16[128,128], index: 5, kind: input, shape index: {}]   ;;  %s848_s6 = inlined_call_operand.vmem [shape: f32[1,128], index: 6, kind: input, shape index: {}]   ;;  %s849_s7 = inlined_call_operand.hbm [shape: f32[16,128], index: 7, kind: output, shape index: {}]  }
   0x1   :  { %13 = vsyncpa [#allocation6], 0 }
   0x2   :  { %14 = vsyncpa [#allocation9], 0 }
   0x3   :  { %15 = vsyncpa [#allocation4], 0  ;;  %s677_s24 = smov [#allocation5]   ;;  %s559_s28 = scalar_lea.hbm %s843_s1, 128 }
   0x4   :  { %s33_s25 = sshll.u32 %s677_s24, 4  ;;  %p560_p0 = scmp.ne.s32.totalorder %s843_s1, %s559_s28  ;;  %s34_s25 = int_to_ptr.vmem [resolvable:$true] %s33_s25 }
   0x5   :  { %p563_p1 = scmp.lt.u32.totalorder %s559_s28, %s843_s1 }
   0x7   :  { %p565_p2 = pnand %p563_p1, %p560_p0 }
   0x9   :  { %568 = shalt.err (!%p565_p2)
}
   0xa   :  { %s569_s10 = scalar_lea.vmem %s34_s25, 128  ;;  %p574_p4 = scmp.lt.s32.totalorder %s34_s25, %s34_s25 }
   0xb   :  { %p570_p3 = scmp.ne.s32.totalorder %s34_s25, %s569_s10  ;;  %p575_p5 = scmp.lt.s32.totalorder %s569_s10, %s569_s10 }
   0xd   :  { %p576_p6 = por %p575_p5, %p574_p4 }
   0xf   :  { %p577_p7 = pnand %p576_p6, %p570_p3 }
  0x11   :  { %580 = shalt.err (!%p577_p7)
}
  0x12   :  { %s678_s11 = smov 64   ;;  %s679_s12 = smov 4  }
  0x13   :  { %39 = dma.hbm_to_vmem [thread:$0]  %s843_s1, 128, %s34_s25, [#allocation6], %s678_s11, %s678_s11, %s679_s12  }
  0x14   :  { %s680_s15 = smov [#allocation2]   ;;  %s581_s19 = scalar_lea.hbm %s842_s0, 256 }
  0x15   :  { %s21_s16 = sshll.u32 %s680_s15, 4  ;;  %p582_p8 = scmp.ne.s32.totalorder %s842_s0, %s581_s19  ;;  %s22_s16 = int_to_ptr.vmem [resolvable:$true] %s21_s16 }
  0x16   :  { %p585_p9 = scmp.lt.u32.totalorder %s581_s19, %s842_s0 }
  0x18   :  { %p587_p10 = pnand %p585_p9, %p582_p8 }
  0x1a   :  { %590 = shalt.err (!%p587_p10)
}
  0x1b   :  { %s591_s24 = scalar_lea.vmem %s22_s16, 256  ;;  %p596_p12 = scmp.lt.s32.totalorder %s22_s16, %s22_s16 }
  0x1c   :  { %p592_p11 = scmp.ne.s32.totalorder %s22_s16, %s591_s24  ;;  %p597_p13 = scmp.lt.s32.totalorder %s591_s24, %s591_s24 }
  0x1e   :  { %p598_p0 = por %p597_p13, %p596_p12 }
  0x20   :  { %p599_p1 = pnand %p598_p0, %p592_p11 }
  0x22   :  { %602 = shalt.err (!%p599_p1)
}
  0x23   :  { %s681_s1 = smov 128   ;;  %s682_s25 = smov 8  }
  0x24   :  { %27 = dma.hbm_to_vmem [thread:$0]  %s842_s0, 256, %s22_s16, [#allocation3], %s681_s1, %s681_s1, %s682_s25  }
  0x25   :  { %s683_s28 = smov [#allocation7]   ;;  %s684_s30 = smov [#allocation8]  }
  0x26   :  { %s47_s29 = sshll.u32 %s683_s28, 4  ;;  %s61_s8 = sshll.u32 %s684_s30, 4  ;;  %s48_s29 = int_to_ptr.vmem [resolvable:$true] %s47_s29  ;;  %s758_s8 = int_to_ptr.vmem [resolvable:$true] %s61_s8 }
  0x27   :  { %s603_s13 = scalar_lea.hbm %s845_s3, 1024 }
  0x28   :  { %p604_p2 = scmp.ne.s32.totalorder %s845_s3, %s603_s13  ;;  %p607_p3 = scmp.lt.u32.totalorder %s603_s13, %s845_s3 }
  0x2a   :  { %p609_p4 = pnand %p607_p3, %p604_p2 }
  0x2c   :  { %612 = shalt.err (!%p609_p4)
}
  0x2d   :  { %s613_s0 = scalar_lea.vmem %s48_s29, 1024  ;;  %p618_p6 = scmp.lt.s32.totalorder %s48_s29, %s48_s29 }
  0x2e   :  { %p614_p5 = scmp.ne.s32.totalorder %s48_s29, %s613_s0  ;;  %p619_p7 = scmp.lt.s32.totalorder %s613_s0, %s613_s0 }
  0x30   :  { %p620_p8 = por %p619_p7, %p618_p6 }
  0x32   :  { %p621_p9 = pnand %p620_p8, %p614_p5 }
  0x34   :  { %624 = shalt.err (!%p621_p9)
}
  0x35   :  { %53 = dma.hbm_to_vmem [thread:$0]  %s845_s3, 1024, %s48_s29, [#allocation6], %s678_s11, %s678_s11, %s679_s12  }
  0x36   :  { %s625_s22 = scalar_lea.hbm %s847_s5, 1024 }
  0x37   :  { %p626_p10 = scmp.ne.s32.totalorder %s847_s5, %s625_s22  ;;  %p629_p11 = scmp.lt.u32.totalorder %s625_s22, %s847_s5 }
  0x39   :  { %p631_p12 = pnand %p629_p11, %p626_p10 }
  0x3b   :  { %634 = shalt.err (!%p631_p12)
}
  0x3c   :  { %s635_s28 = scalar_lea.vmem %s758_s8, 1024  ;;  %p640_p0 = scmp.lt.s32.totalorder %s758_s8, %s758_s8 }
  0x3d   :  { %p636_p13 = scmp.ne.s32.totalorder %s758_s8, %s635_s28  ;;  %p641_p1 = scmp.lt.s32.totalorder %s635_s28, %s635_s28 }
  0x3f   :  { %p642_p2 = por %p641_p1, %p640_p0 }
  0x41   :  { %p643_p3 = pnand %p642_p2, %p636_p13 }
  0x43   :  { %646 = shalt.err (!%p643_p3)
}
  0x44   :  { %67 = dma.hbm_to_vmem [thread:$0]  %s847_s5, 1024, %s758_s8, [#allocation9], %s678_s11, %s678_s11, %s679_s12  }
  0x45   :  { %669 = dma.done.wait [#allocation3], 256  }
  0x46   :  { %670 = vsyncadd [#allocation3], 4294967040 }
  0x47   :  { %671 = dma.done.wait [#allocation6], 1152  }
  0x48   :  { %672 = vsyncadd [#allocation6], 4294966144 }
  0x49   :  { %673 = dma.done.wait [#allocation9], 1024  }
  0x4a   :  { %674 = vsyncadd [#allocation9], 4294966272  ;;  %v685_v0 = vmov 0.0   ;;  %vm686_vm0 = vmmov 0   ;;  %v530_v1 = vld [vmem:[#allocation5] sm:$0xff]   ;;  %v83_v2 = vld [vmem:[#allocation2] sm:$0xff]  ;;  %v406_v56 = vlaneseq }
  0x4b   :  { %473 = vmatprep.subr.bf16.mxu0 %v685_v0  ;;  %475 = vmatprep.mubr.msk.bf16.mxu0 %vm686_vm0, %v685_v0  ;;  %v84_v3 = vld [vmem:[#allocation2 + $0x8] sm:$0xff]  ;;  %vm101_vm1 = vcmask 130048   ;;  %v531_v5 = vld [vmem:[#allocation7] sm:$0xff]   ;;  %v532_v6 = vld [vmem:[#allocation7 + $0x8] sm:$0xff]  }
  0x4c   :  { %479 = vmatprep.subr.bf16.mxu1 %v685_v0  ;;  %495 = vmatprep.mubr.msk.bf16.mxu1 %vm686_vm0, %v685_v0  ;;  %v85_v4 = vpack.c.bf16 %v84_v3, %v83_v2  ;;  %v533_v7 = vld [vmem:[#allocation7 + $0x10] sm:$0xff]   ;;  %v534_v8 = vld [vmem:[#allocation7 + $0x18] sm:$0xff]   ;;  %v535_v9 = vld [vmem:[#allocation7 + $0x20] sm:$0xff]   ;;  %v407_v62 = vand.u32 127, %v406_v56 }
  0x4d   :  { %474 = vmatpush3.bf16.msra.mxu0 %v530_v1  ;;  %480 = vmatpush3.bf16.msra.mxu1 %v531_v5  ;;  %v536_v10 = vld [vmem:[#allocation7 + $0x28] sm:$0xff]   ;;  %v537_v11 = vld [vmem:[#allocation7 + $0x30] sm:$0xff]   ;;  %v538_v12 = vld [vmem:[#allocation7 + $0x38] sm:$0xff]  }
  0x4e   :  { %499 = vmatprep.subr.bf16.mxu0 %v685_v0  ;;  %481 = vmatprep.subr.bf16.mxu1 %v685_v0  ;;  %v539_v13 = vld [vmem:[#allocation8] sm:$0xff]   ;;  %v540_v14 = vld [vmem:[#allocation8 + $0x8] sm:$0xff]   ;;  %v541_v15 = vld [vmem:[#allocation8 + $0x10] sm:$0xff]   ;;  %vm408_vm5 = vcmp.lt.s32.totalorder %v407_v62, 4 }
  0x4f   :  { %v542_v16 = vld [vmem:[#allocation8 + $0x18] sm:$0xff]   ;;  %v543_v17 = vld [vmem:[#allocation8 + $0x20] sm:$0xff]   ;;  %v544_v18 = vld [vmem:[#allocation8 + $0x28] sm:$0xff]  }
  0x50   :  { %476 = vmatmul.mubr.msk.bf16.vlgmr.msra.gmra.mrb[0].mxu0 %vm101_vm1, %v85_v4  ;;  %v432_v19 = vld [vmem:[%s844_s2] ss:$0 sm:$0xff]  ;;  %v545_v29 = vld [vmem:[#allocation8 + $0x30] sm:$0xff]   ;;  %v546_v30 = vld [vmem:[#allocation8 + $0x38] sm:$0xff]  }
  0x51   :  { %515 = vmatprep.mubr.msk.bf16.mxu0 %vm686_vm0, %v685_v0  ;;  %482 = vmatpush3.bf16.msra.mxu1 %v532_v6  ;;  %v435_v31 = vld [vmem:[%s846_s4] ss:$0 sm:$0xff]  ;;  %s687_s4 = smov [#allocation10]  }
  0x52   :  { %483 = vmatprep.subr.bf16.mxu1 %v685_v0  ;;  %500 = vmatpush3.bf16.msra.mxu0 %v539_v13  ;;  %v444_v41 = vld [vmem:[%s848_s6] ss:$0 sm:$0xff]  ;;  %s418_s6 = sshll.u32 %s687_s4, 4  ;;  %s419_s6 = int_to_ptr.vmem [resolvable:$true] %s418_s6 }
  0x53   :  { %501 = vmatprep.subr.bf16.mxu0 %v685_v0  ;;  %s647_s9 = scalar_lea.vmem %s419_s6, 256  ;;  %p652_p5 = scmp.lt.s32.totalorder %s419_s6, %s419_s6 }
  0x54   :  { %p648_p4 = scmp.ne.s32.totalorder %s419_s6, %s647_s9  ;;  %p653_p6 = scmp.lt.s32.totalorder %s647_s9, %s647_s9 }
  0x55   :  { %484 = vmatpush3.bf16.msra.mxu1 %v533_v7 }
  0x56   :  { %485 = vmatprep.subr.bf16.mxu1 %v685_v0  ;;  %502 = vmatpush3.bf16.msra.mxu0 %v540_v14  ;;  %p654_p7 = por %p653_p6, %p652_p5 }
  0x57   :  { %503 = vmatprep.subr.bf16.mxu0 %v685_v0 }
  0x58   :  { %p655_p8 = pnand %p654_p7, %p648_p4 }
  0x59   :  { %486 = vmatpush3.bf16.msra.mxu1 %v534_v8 }
  0x5a   :  { %487 = vmatprep.subr.bf16.mxu1 %v685_v0  ;;  %504 = vmatpush3.bf16.msra.mxu0 %v541_v15 }
  0x5b   :  { %505 = vmatprep.subr.bf16.mxu0 %v685_v0 }
  0x5d   :  { %488 = vmatpush3.bf16.msra.mxu1 %v535_v9 }
  0x5e   :  { %489 = vmatprep.subr.bf16.mxu1 %v685_v0  ;;  %506 = vmatpush3.bf16.msra.mxu0 %v542_v16 }
  0x5f   :  { %507 = vmatprep.subr.bf16.mxu0 %v685_v0 }
  0x61   :  { %490 = vmatpush3.bf16.msra.mxu1 %v536_v10 }
  0x62   :  { %491 = vmatprep.subr.bf16.mxu1 %v685_v0  ;;  %508 = vmatpush3.bf16.msra.mxu0 %v543_v17 }
  0x63   :  { %509 = vmatprep.subr.bf16.mxu0 %v685_v0 }
  0x65   :  { %492 = vmatpush3.bf16.msra.mxu1 %v537_v11 }
  0x66   :  { %493 = vmatprep.subr.bf16.mxu1 %v685_v0  ;;  %510 = vmatpush3.bf16.msra.mxu0 %v544_v18 }
  0x67   :  { %511 = vmatprep.subr.bf16.mxu0 %v685_v0 }
  0x69   :  { %494 = vmatpush3.bf16.msra.mxu1 %v538_v12 }
  0x6a   :  { %512 = vmatpush3.bf16.msra.mxu0 %v545_v29 }
  0x6b   :  { %513 = vmatprep.subr.bf16.mxu0 %v685_v0 }
  0x6e   :  { %514 = vmatpush3.bf16.msra.mxu0 %v546_v30 }
 0x123   :  { %v139_v20 = vpop.f32.mrb[0].mxu0 }
 0x124   :  { %v140_v21 = vadd.f32 %v432_v19, %v139_v20  ;;  %v477_v22 = vpop.f32.mrb[1].mxu0 }
 0x125   :  { %v142_v23 = vpop.f32.mrb[2].mxu0 }
 0x126   :  { %v143_v24 = vadd.f32 %v432_v19, %v142_v23  ;;  %v478_v25 = vpop.f32.mrb[3].mxu0  ;;  %v146_v26 = vmax.f32 %v140_v21, 0.0 }
 0x128   :  { %v147_v27 = vmax.f32 %v143_v24, 0.0 }
 0x12a   :  { %v148_v28 = vpack.c.bf16 %v147_v27, %v146_v26 }
 0x12c   :  { %496 = vmatmul.mubr.bf16.vlgmr.msra.gmra.mrb[0].mxu1 %v148_v28 }
 0x1ff   :  { %v254_v32 = vpop.f32.mrb[0].mxu1 }
 0x200   :  { %v255_v33 = vadd.f32 %v435_v31, %v254_v32  ;;  %v497_v34 = vpop.f32.mrb[1].mxu1 }
 0x201   :  { %v257_v35 = vpop.f32.mrb[2].mxu1 }
 0x202   :  { %v258_v36 = vadd.f32 %v435_v31, %v257_v35  ;;  %v498_v37 = vpop.f32.mrb[3].mxu1  ;;  %v261_v38 = vmax.f32 %v255_v33, 0.0 }
 0x204   :  { %v262_v39 = vmax.f32 %v258_v36, 0.0 }
 0x206   :  { %v263_v40 = vpack.c.bf16 %v262_v39, %v261_v38 }
 0x208   :  { %516 = vmatmul.mubr.bf16.vlgmr.msra.gmra.mrb[4].mxu0 %v263_v40 }
 0x2db   :  { %v369_v42 = vpop.f32.mrb[4].mxu0 }
 0x2dc   :  { %v370_v43 = vadd.f32 %v444_v41, %v369_v42  ;;  %v517_v44 = vpop.f32.mrb[5].mxu0 }
 0x2dd   :  { %v372_v45 = vpop.f32.mrb[6].mxu0 }
 0x2de   :  { %v380_v46 = vmul.f32 1.442695, %v370_v43  ;;  %v373_v47 = vadd.f32 %v444_v41, %v372_v45  ;;  %v518_v48 = vpop.f32.mrb[7].mxu0  ;;  %vm378_vm3 = vcmp.gt.f32.partialorder %v370_v43, 20.0 }
 0x2e0   :  { %547 = vpow2.f32 %v380_v46  ;;  %v382_v49 = vmul.f32 1.442695, %v373_v47  ;;  %vm379_vm6 = vcmp.gt.f32.partialorder %v373_v47, 20.0 }
 0x2e2   :  { %549 = vpow2.f32 %v382_v49 }
 0x2ea   :  { %v548_v50 = vpop.eup %547 }
 0x2eb   :  { %v384_v51 = vadd.f32 1.0, %v548_v50  ;;  %v387_v54 = vmul.f32 -0.5, %v548_v50  ;;  %v390_v58 = vand.u32 2147483647, %v548_v50 }
 0x2ec   :  { %v550_v52 = vpop.eup %549 }
 0x2ed   :  { %551 = vlog2.f32 %v384_v51  ;;  %v393_v53 = vadd.f32 1.0, %v550_v52  ;;  %v396_v55 = vmul.f32 -0.5, %v550_v52  ;;  %v388_v57 = vadd.f32 1.0, %v387_v54 }
 0x2ee   :  { %v399_v61 = vand.u32 2147483647, %v550_v52  ;;  %vm391_vm2 = vcmp.lt.f32.partialorder %v390_v58, 0.0004427343 }
 0x2ef   :  { %553 = vlog2.f32 %v393_v53  ;;  %v397_v59 = vadd.f32 1.0, %v396_v55  ;;  %v389_v0 = vmul.f32 %v548_v50, %v388_v57 }
 0x2f0   :  { %555 = vtanh.f32 %v370_v43  ;;  %vm400_vm4 = vcmp.lt.f32.partialorder %v399_v61, 0.0004427343 }
 0x2f1   :  { %557 = vtanh.f32 %v373_v47  ;;  %v398_v4 = vmul.f32 %v550_v52, %v397_v59 }
 0x2f7   :  { %v552_v60 = vpop.eup %551 }
 0x2f8   :  { %v386_v63 = vmul.f32 0.6931472, %v552_v60 }
 0x2f9   :  { %v554_v1 = vpop.eup %553 }
 0x2fa   :  { %v392_v2 = vsel %vm391_vm2, %v389_v0, %v386_v63  ;;  %v395_v3 = vmul.f32 0.6931472, %v554_v1  ;;  %v556_v8 = vpop.eup %555 }
 0x2fb   :  { %v402_v5 = vsel %vm378_vm3, %v370_v43, %v392_v2  ;;  %v558_v12 = vpop.eup %557 }
 0x2fc   :  { %v404_v6 = vadd.f32 0.001, %v402_v5  ;;  %v401_v7 = vsel %vm400_vm4, %v398_v4, %v395_v3 }
 0x2fd   :  { %v403_v9 = vsel %vm379_vm6, %v373_v47, %v401_v7 }
 0x2fe   :  { %v405_v10 = vadd.f32 0.001, %v403_v9  ;;  %v409_v11 = vsel %vm408_vm5, %v556_v8, %v404_v6 }
 0x2ff   :  { %411 = vst [vmem:[#allocation10] sm:$0xff] %v409_v11 }
 0x300   :  { %v410_v13 = vsel %vm408_vm5, %v558_v12, %v405_v10 }
 0x301   :  { %412 = vst [vmem:[#allocation10 + $0x8] sm:$0xff] %v410_v13 }
 0x302   :  { %658 = shalt.err (!%p655_p8)
}
 0x303   :  { %s659_s14 = scalar_lea.hbm %s849_s7, 256 }
 0x304   :  { %p660_p9 = scmp.ne.s32.totalorder %s849_s7, %s659_s14  ;;  %p663_p10 = scmp.lt.u32.totalorder %s659_s14, %s849_s7 }
 0x306   :  { %p665_p11 = pnand %p663_p10, %p660_p9 }
 0x308   :  { %668 = shalt.err (!%p665_p11)
}
 0x309   :  { %424 = dma.vmem_to_hbm [thread:$0]  %s419_s6, 256, %s849_s7, [#allocation4], %s681_s1, %s681_s1, %s682_s25  }
 0x30a   :  { %675 = dma.done.wait [#allocation4], 256  }
 0x30b   :  { %676 = vsyncadd [#allocation4], 4294967040 }
 0x30c   :  { %428 = vsyncpa [#allocation3], 1 }
 0x30d   :  { %429 = vsyncpa [#allocation6], 1 }
 0x30e   :  { %430 = vsyncpa [#allocation9], 1 }
 0x30f   :  { %431 = vsyncpa [#allocation4], 1 }

</bundles_post_ra>
